<compile_context>
chip_gen: v7x
topology: tpu7x:2x2x1
jax: 0.10.0
libtpu: 0.0.40
codegen_flags: <defaults>
</compile_context>

<pallas_src>
import jax
import jax.numpy as jnp
from jax.experimental import pallas as pl
from jax.experimental.pallas import tpu as pltpu


def _round_up(x: int, m: int) -> int:
    return ((x + m - 1) // m) * m


def _matmul_kernel_single(a_ref, b_ref, o_ref):
    """Whole K fits in one tile: no accumulator, no init/finalize."""
    o_ref[...] = jnp.dot(
        a_ref[...], b_ref[...], preferred_element_type=jnp.float32
    ).astype(o_ref.dtype)


def _matmul_kernel_acc_out(a_ref, b_ref, o_ref):
    """f32 output: accumulate straight into the resident output tile."""
    @pl.when(pl.program_id(2) == 0)
    def _():
        o_ref[...] = jnp.zeros_like(o_ref)

    o_ref[...] += jnp.dot(
        a_ref[...], b_ref[...], preferred_element_type=jnp.float32
    )


def _matmul_kernel_acc_scratch(a_ref, b_ref, o_ref, acc_ref):
    """Low-precision output: accumulate in f32 scratch, cast on last K step."""
    @pl.when(pl.program_id(2) == 0)
    def _():
        acc_ref[...] = jnp.zeros_like(acc_ref)

    acc_ref[...] += jnp.dot(
        a_ref[...], b_ref[...], preferred_element_type=jnp.float32
    )

    @pl.when(pl.program_id(2) == pl.num_programs(2) - 1)
    def _():
        o_ref[...] = acc_ref[...].astype(o_ref.dtype)


def single_op_model_forward(a, b, *, tm=256, tn=512, tk=512):
    """Pallas equivalent of SingleOpModel(torch.matmul, {}).forward(a, b) (2-D)."""
    M, K = a.shape
    K2, N = b.shape
    assert K == K2, "inner dims must match"

    out_dtype = jnp.result_type(a.dtype, b.dtype)
    itemsize = jnp.dtype(a.dtype).itemsize
    out_itemsize = jnp.dtype(out_dtype).itemsize

    # Clamp tile sizes to the (padded) problem, keeping (8,128) alignment.
    tm = min(tm, _round_up(M, 128))
    tn = min(tn, _round_up(N, 128))
    tk = min(tk, _round_up(K, 128))

    Mp, Np, Kp = _round_up(M, tm), _round_up(N, tn), _round_up(K, tk)

    # Zero-pad edge tiles so out-of-range rows/cols contribute exactly 0.
    if (Mp, Kp) != (M, K):
        a = jnp.pad(a, ((0, Mp - M), (0, Kp - K)))
    if (Kp, Np) != (K, N):
        b = jnp.pad(b, ((0, Kp - K), (0, Np - N)))

    gm, gn, gk = Mp // tm, Np // tn, Kp // tk

    cost = pl.CostEstimate(
        flops=2 * M * N * K,
        transcendentals=0,
        bytes_accessed=(M * K + K * N) * itemsize + M * N * out_itemsize,
    )

    # VMEM budget: double-buffered A/B/O tiles (+ f32 acc if used).
    tile_bytes = (
        2 * (tm * tk + tk * tn) * itemsize + 2 * tm * tn * out_itemsize
    )
    if gk > 1 and out_dtype != jnp.float32:
        tile_bytes += tm * tn * 4
    vmem_limit = int(min(max(2 * tile_bytes, 32 * 1024 * 1024),
                         48 * 1024 * 1024))

    if gk == 1:
        kernel = _matmul_kernel_single
        grid = (gm, gn)
        in_specs = [
            pl.BlockSpec((tm, tk), lambda i, j: (i, 0)),
            pl.BlockSpec((tk, tn), lambda i, j: (0, j)),
        ]
        out_specs = pl.BlockSpec((tm, tn), lambda i, j: (i, j))
        scratch_shapes = []
        dim_sem = ("parallel", "parallel")
    else:
        grid = (gm, gn, gk)
        in_specs = [
            pl.BlockSpec((tm, tk), lambda i, j, k: (i, k)),
            pl.BlockSpec((tk, tn), lambda i, j, k: (k, j)),
        ]
        out_specs = pl.BlockSpec((tm, tn), lambda i, j, k: (i, j))
        dim_sem = ("parallel", "parallel", "arbitrary")
        if out_dtype == jnp.float32:
            kernel = _matmul_kernel_acc_out
            scratch_shapes = []
        else:
            kernel = _matmul_kernel_acc_scratch
            scratch_shapes = [pltpu.VMEM((tm, tn), jnp.float32)]

    out = pl.pallas_call(
        kernel,
        out_shape=jax.ShapeDtypeStruct((Mp, Np), out_dtype),
        grid_spec=pltpu.PrefetchScalarGridSpec(
            num_scalar_prefetch=0,
            grid=grid,
            in_specs=in_specs,
            out_specs=out_specs,
            scratch_shapes=scratch_shapes,
        ),
        compiler_params=pltpu.CompilerParams(
            dimension_semantics=dim_sem,
            vmem_limit_bytes=vmem_limit,
        ),
        cost_estimate=cost,
    )(a, b)

    if (Mp, Np) != (M, N):
        out = out[:M, :N]
    return out


if __name__ == "__main__":
    key = jax.random.PRNGKey(0)
    ka, kb, kc, kd = jax.random.split(key, 4)

    # Case 1: tile-aligned small shapes (M=128, K=256, N=128) -> single-step
    # grid (1,1), no accumulator, no padding.
    M, K, N = 128, 256, 128
    a = jax.random.normal(ka, (M, K), dtype=jnp.float32)
    b = jax.random.normal(kb, (K, N), dtype=jnp.float32)
    out = jax.block_until_ready(single_op_model_forward(a, b))
    ref = jnp.matmul(a, b)
    assert out.shape == (M, N) and out.dtype == jnp.float32
    assert jnp.allclose(out, ref, atol=1e-4, rtol=1e-4), "mismatch (aligned case)"

    # Case 2: non-tile-multiple shapes exercise the zero-padding path.
    M2, K2, N2 = 130, 70, 200
    a2 = jax.random.normal(kc, (M2, K2), dtype=jnp.float32)
    b2 = jax.random.normal(kd, (K2, N2), dtype=jnp.float32)
    out2 = jax.block_until_ready(single_op_model_forward(a2, b2))
    ref2 = jnp.matmul(a2, b2)
    assert out2.shape == (M2, N2)
    assert jnp.allclose(out2, ref2, atol=1e-4, rtol=1e-4), "mismatch (padded case)"

    print("KERNEL_OK")
</pallas_src>

<mosaic_0001>
module attributes {stable_mosaic.version = 11 : i64} {
  func.func @_matmul_kernel_single(%arg0: i32, %arg1: i32, %arg2: memref<128x256xf32, #tpu.memory_space<vmem>>, %arg3: memref<256x128xf32, #tpu.memory_space<vmem>>, %arg4: memref<128x128xf32, #tpu.memory_space<vmem>>) attributes {dimension_semantics = [#tpu.dimension_semantics<parallel>, #tpu.dimension_semantics<parallel>], iteration_bounds = array<i64: 1, 1>, scalar_prefetch = 0 : i64, scratch_operands = 0 : i64, tpu.core_type = #tpu.core_type<tc>, window_params = [{transform_indices = @transform_0, window_bounds = array<i64: 128, 256>}, {transform_indices = @transform_1, window_bounds = array<i64: 256, 128>}, {transform_indices = @transform_2, window_bounds = array<i64: 128, 128>}]} {
    %c0 = arith.constant 0 : index
    %c0_0 = arith.constant 0 : index
    %0 = vector.load %arg2[%c0, %c0_0] : memref<128x256xf32, #tpu.memory_space<vmem>>, vector<128x256xf32>
    %c0_1 = arith.constant 0 : index
    %c0_2 = arith.constant 0 : index
    %1 = vector.load %arg3[%c0_1, %c0_2] : memref<256x128xf32, #tpu.memory_space<vmem>>, vector<256x128xf32>
    %cst = arith.constant dense<0.000000e+00> : vector<128x128xf32>
    %2 = tpu.matmul %0, %1, %cst {dimension_numbers = #tpu.dot_dimension_numbers<[1], [0], [0], [1], [0, 0, 1, 1], [], []>} : vector<128x256xf32>, vector<256x128xf32>, vector<128x128xf32> -> vector<128x128xf32>
    %c0_3 = arith.constant 0 : index
    %c0_4 = arith.constant 0 : index
    %3 = vector.load %arg4[%c0_3, %c0_4] : memref<128x128xf32, #tpu.memory_space<vmem>>, vector<128x128xf32>
    tpu.vector_store %arg4[%c0_3, %c0_4], %2 {strides = array<i32>} : memref<128x128xf32, #tpu.memory_space<vmem>>, vector<128x128xf32>,
    return
  }
  func.func @transform_0(%arg0: i32, %arg1: i32) -> (i32, i32) {
    %c0_i32 = arith.constant 0 : i32
    %c0_i32_0 = arith.constant 0 : i32
    return %arg0, %c0_i32 : i32, i32
  }
  func.func @transform_1(%arg0: i32, %arg1: i32) -> (i32, i32) {
    %c0_i32 = arith.constant 0 : i32
    %c0_i32_0 = arith.constant 0 : i32
    return %c0_i32, %arg1 : i32, i32
  }
  func.func @transform_2(%arg0: i32, %arg1: i32) -> (i32, i32) {
    %c0_i32 = arith.constant 0 : i32
    return %arg0, %arg1 : i32, i32
  }
}

</mosaic_0001>

<bundles_post_ra>
// kernel: tpu_custom_call.1
= control target key start
LH: loop header
LB: loop body
LE: loop exit
PB: predicated region body
PF: predicated region fallthrough
CT: control target
= control target key end

     0   :  { %7 = vsyncpa [#allocation3], 0  ;;  %s554_s0 = inlined_call_operand.hbm [shape: f32[128,256], index: 0, kind: input, shape index: {}]   ;;  %s555_s1 = inlined_call_operand.hbm [shape: f32[256,128], index: 1, kind: input, shape index: {}]   ;;  %s556_s2 = inlined_call_operand.hbm [shape: f32[128,128], index: 2, kind: output, shape index: {}]  }
   0x1   :  { %8 = vsyncpa [#allocation6], 0 }
   0x2   :  { %9 = vsyncpa [#allocation4], 0  ;;  %s490_s9 = smov [#allocation2]   ;;  %s418_s13 = scalar_lea.hbm %s554_s0, 4096 }
   0x3   :  { %s15_s10 = sshll.u32 %s490_s9, 4  ;;  %p419_p0 = scmp.ne.s32.totalorder %s554_s0, %s418_s13  ;;  %s16_s10 = int_to_ptr.vmem [resolvable:$true] %s15_s10 }
   0x4   :  { %p422_p1 = scmp.lt.u32.totalorder %s418_s13, %s554_s0 }
   0x6   :  { %p424_p2 = pnand %p422_p1, %p419_p0 }
   0x8   :  { %427 = shalt.err (!%p424_p2)
}
   0x9   :  { %s428_s18 = scalar_lea.vmem %s16_s10, 4096  ;;  %p433_p4 = scmp.lt.s32.totalorder %s16_s10, %s16_s10 }
   0xa   :  { %p429_p3 = scmp.ne.s32.totalorder %s16_s10, %s428_s18  ;;  %p434_p5 = scmp.lt.s32.totalorder %s428_s18, %s428_s18 }
   0xc   :  { %p435_p6 = por %p434_p5, %p433_p4 }
   0xe   :  { %p436_p7 = pnand %p435_p6, %p429_p3 }
  0x10   :  { %439 = shalt.err (!%p436_p7)
}
  0x11   :  { %s491_s19 = smov 256   ;;  %s492_s20 = smov 16  }
  0x12   :  { %21 = dma.hbm_to_vmem [thread:$0]  %s554_s0, 4096, %s16_s10, [#allocation3], %s491_s19, %s491_s19, %s492_s20  }
  0x13   :  { %s493_s23 = smov [#allocation5]   ;;  %s440_s27 = scalar_lea.hbm %s555_s1, 4096 }
  0x14   :  { %s27_s24 = sshll.u32 %s493_s23, 4  ;;  %p441_p8 = scmp.ne.s32.totalorder %s555_s1, %s440_s27  ;;  %s28_s24 = int_to_ptr.vmem [resolvable:$true] %s27_s24 }
  0x15   :  { %p444_p9 = scmp.lt.u32.totalorder %s440_s27, %s555_s1 }
  0x17   :  { %p446_p10 = pnand %p444_p9, %p441_p8 }
  0x19   :  { %449 = shalt.err (!%p446_p10)
}
  0x1a   :  { %s450_s4 = scalar_lea.vmem %s28_s24, 4096  ;;  %p455_p12 = scmp.lt.s32.totalorder %s28_s24, %s28_s24 }
  0x1b   :  { %p451_p11 = scmp.ne.s32.totalorder %s28_s24, %s450_s4  ;;  %p456_p13 = scmp.lt.s32.totalorder %s450_s4, %s450_s4 }
  0x1d   :  { %p457_p0 = por %p456_p13, %p455_p12 }
  0x1f   :  { %p458_p1 = pnand %p457_p0, %p451_p11 }
  0x21   :  { %461 = shalt.err (!%p458_p1)
}
  0x22   :  { %s494_s0 = smov 128   ;;  %s495_s5 = smov 8  }
  0x23   :  { %33 = dma.hbm_to_vmem [thread:$0]  %s555_s1, 4096, %s28_s24, [#allocation6], %s494_s0, %s494_s0, %s495_s5  }
  0x24   :  { %484 = dma.done.wait [#allocation3], 4096  }
  0x25   :  { %485 = vsyncadd [#allocation3], 4294963200 }
  0x26   :  { %486 = dma.done.wait [#allocation6], 4096  }
  0x27   :  { %487 = vsyncadd [#allocation6], 4294963200  ;;  %v88_v0 = vld [vmem:[#allocation5 + $0x80] sm:$0xff]  ;;  %v89_v1 = vld [vmem:[#allocation5 + $0x88] sm:$0xff]  ;;  %s496_s1 = smov [#allocation7]  }
  0x28   :  { %v72_v2 = vld [vmem:[#allocation5] sm:$0xff]  ;;  %v363_v3 = vpack.c.bf16 %v89_v1, %v88_v0  ;;  %v73_v4 = vld [vmem:[#allocation5 + $0x8] sm:$0xff]  ;;  %v90_v5 = vld [vmem:[#allocation5 + $0x90] sm:$0xff]  ;;  %s270_s8 = sshll.u32 %s496_s1, 4  ;;  %s271_s8 = int_to_ptr.vmem [resolvable:$true] %s270_s8 }
  0x29   :  { %v91_v6 = vld [vmem:[#allocation5 + $0x98] sm:$0xff]  ;;  %v365_v7 = vpack.c.bf16 %v73_v4, %v72_v2  ;;  %v74_v9 = vld [vmem:[#allocation5 + $0x10] sm:$0xff]  ;;  %v92_v11 = vld [vmem:[#allocation5 + $0xa0] sm:$0xff]  ;;  %s462_s9 = scalar_lea.vmem %s271_s8, 2048  ;;  %p467_p3 = scmp.lt.s32.totalorder %s271_s8, %s271_s8 }
  0x2a   :  { %v367_v8 = vpack.c.bf16 %v91_v6, %v90_v5  ;;  %v75_v10 = vld [vmem:[#allocation5 + $0x18] sm:$0xff]  ;;  %364 = vmatprep.subr.bf16.mxu0 %v363_v3  ;;  %395 = vmatprep.subr.bf16.mxu1 %v363_v3  ;;  %v93_v12 = vld [vmem:[#allocation5 + $0xa8] sm:$0xff]  ;;  %v76_v15 = vld [vmem:[#allocation5 + $0x20] sm:$0xff]  ;;  %p463_p2 = scmp.ne.s32.totalorder %s271_s8, %s462_s9  ;;  %p468_p4 = scmp.lt.s32.totalorder %s462_s9, %s462_s9 }
  0x2b   :  { %366 = vmatpush3.bf16.msra.mxu0 %v365_v7  ;;  %403 = vmatpush3.bf16.msra.mxu1 %v365_v7  ;;  %v369_v13 = vpack.c.bf16 %v75_v10, %v74_v9  ;;  %v371_v14 = vpack.c.bf16 %v93_v12, %v92_v11  ;;  %v77_v16 = vld [vmem:[#allocation5 + $0x28] sm:$0xff]  ;;  %v94_v17 = vld [vmem:[#allocation5 + $0xb0] sm:$0xff]  ;;  %v95_v18 = vld [vmem:[#allocation5 + $0xb8] sm:$0xff] }
  0x2c   :  { %368 = vmatprep.subr.bf16.mxu0 %v367_v8  ;;  %396 = vmatprep.subr.bf16.mxu1 %v367_v8  ;;  %v373_v19 = vpack.c.bf16 %v77_v16, %v76_v15  ;;  %v375_v20 = vpack.c.bf16 %v95_v18, %v94_v17  ;;  %v78_v21 = vld [vmem:[#allocation5 + $0x30] sm:$0xff]  ;;  %v79_v22 = vld [vmem:[#allocation5 + $0x38] sm:$0xff]  ;;  %v96_v23 = vld [vmem:[#allocation5 + $0xc0] sm:$0xff]  ;;  %p469_p5 = por %p468_p4, %p467_p3 }
  0x2d   :  { %v97_v24 = vld [vmem:[#allocation5 + $0xc8] sm:$0xff]  ;;  %v377_v27 = vpack.c.bf16 %v79_v22, %v78_v21  ;;  %v80_v29 = vld [vmem:[#allocation5 + $0x40] sm:$0xff]  ;;  %v98_v31 = vld [vmem:[#allocation5 + $0xd0] sm:$0xff] }
  0x2e   :  { %v41_v25 = vld [vmem:[#allocation2 + $0x8] sm:$0xff]  ;;  %v379_v28 = vpack.c.bf16 %v97_v24, %v96_v23  ;;  %v99_v32 = vld [vmem:[#allocation5 + $0xd8] sm:$0xff]  ;;  %v82_v35 = vld [vmem:[#allocation5 + $0x50] sm:$0xff]  ;;  %p470_p6 = pnand %p469_p5, %p463_p2 }
  0x2f   :  { %370 = vmatpush3.bf16.msra.mxu0 %v369_v13  ;;  %404 = vmatpush3.bf16.msra.mxu1 %v369_v13  ;;  %v57_v26 = vld [vmem:[#allocation2 + $0x88] sm:$0xff]  ;;  %v383_v34 = vpack.c.bf16 %v99_v32, %v98_v31  ;;  %v83_v36 = vld [vmem:[#allocation5 + $0x58] sm:$0xff]  ;;  %v100_v37 = vld [vmem:[#allocation5 + $0xe0] sm:$0xff] }
  0x30   :  { %372 = vmatprep.subr.bf16.mxu0 %v371_v14  ;;  %397 = vmatprep.subr.bf16.mxu1 %v371_v14  ;;  %v81_v30 = vld [vmem:[#allocation5 + $0x48] sm:$0xff]  ;;  %v385_v39 = vpack.c.bf16 %v83_v36, %v82_v35  ;;  %v84_v41 = vld [vmem:[#allocation5 + $0x60] sm:$0xff]  ;;  %v102_v43 = vld [vmem:[#allocation5 + $0xf0] sm:$0xff] }
  0x31   :  { %168 = vmatprep.mubr.f32.mxu0 %v41_v25  ;;  %208 = vmatprep.mubr.f32.mxu1 %v57_v26  ;;  %v381_v33 = vpack.c.bf16 %v81_v30, %v80_v29  ;;  %v101_v38 = vld [vmem:[#allocation5 + $0xe8] sm:$0xff]  ;;  %v103_v44 = vld [vmem:[#allocation5 + $0xf8] sm:$0xff]  ;;  %v86_v47 = vld [vmem:[#allocation5 + $0x70] sm:$0xff] }
  0x32   :  { %v387_v40 = vpack.c.bf16 %v101_v38, %v100_v37  ;;  %v85_v42 = vld [vmem:[#allocation5 + $0x68] sm:$0xff]  ;;  %v391_v46 = vpack.c.bf16 %v103_v44, %v102_v43  ;;  %v87_v48 = vld [vmem:[#allocation5 + $0x78] sm:$0xff]  ;;  %v40_v50 = vld [vmem:[#allocation2] sm:$0xff] }
  0x33   :  { %374 = vmatpush3.bf16.msra.mxu0 %v373_v19  ;;  %405 = vmatpush3.bf16.msra.mxu1 %v373_v19  ;;  %v389_v45 = vpack.c.bf16 %v85_v42, %v84_v41  ;;  %v393_v49 = vpack.c.bf16 %v87_v48, %v86_v47  ;;  %v56_v51 = vld [vmem:[#allocation2 + $0x80] sm:$0xff]  ;;  %v43_v52 = vld [vmem:[#allocation2 + $0x18] sm:$0xff]  ;;  %v42_v54 = vld [vmem:[#allocation2 + $0x10] sm:$0xff] }
  0x34   :  { %376 = vmatprep.subr.bf16.mxu0 %v375_v20  ;;  %398 = vmatprep.subr.bf16.mxu1 %v375_v20  ;;  %v59_v53 = vld [vmem:[#allocation2 + $0x98] sm:$0xff]  ;;  %v58_v55 = vld [vmem:[#allocation2 + $0x90] sm:$0xff]  ;;  %v45_v56 = vld [vmem:[#allocation2 + $0x28] sm:$0xff] }
  0x35   :  { %v61_v57 = vld [vmem:[#allocation2 + $0xa8] sm:$0xff]  ;;  %v44_v58 = vld [vmem:[#allocation2 + $0x20] sm:$0xff]  ;;  %v47_v60 = vld [vmem:[#allocation2 + $0x38] sm:$0xff] }
  0x36   :  { %v60_v59 = vld [vmem:[#allocation2 + $0xa0] sm:$0xff]  ;;  %v63_v61 = vld [vmem:[#allocation2 + $0xb8] sm:$0xff]  ;;  %v46_v62 = vld [vmem:[#allocation2 + $0x30] sm:$0xff] }
  0x37   :  { %378 = vmatpush3.bf16.msra.mxu0 %v377_v27  ;;  %406 = vmatpush3.bf16.msra.mxu1 %v377_v27  ;;  %v62_v63 = vld [vmem:[#allocation2 + $0xb0] sm:$0xff]  ;;  %v49_v0 = vld [vmem:[#allocation2 + $0x48] sm:$0xff]  ;;  %v48_v2 = vld [vmem:[#allocation2 + $0x40] sm:$0xff] }
  0x38   :  { %380 = vmatprep.subr.bf16.mxu0 %v379_v28  ;;  %399 = vmatprep.subr.bf16.mxu1 %v379_v28  ;;  %v65_v1 = vld [vmem:[#allocation2 + $0xc8] sm:$0xff]  ;;  %v64_v3 = vld [vmem:[#allocation2 + $0xc0] sm:$0xff]  ;;  %v51_v4 = vld [vmem:[#allocation2 + $0x58] sm:$0xff] }
  0x39   :  { %v67_v5 = vld [vmem:[#allocation2 + $0xd8] sm:$0xff]  ;;  %v50_v6 = vld [vmem:[#allocation2 + $0x50] sm:$0xff]  ;;  %v53_v8 = vld [vmem:[#allocation2 + $0x68] sm:$0xff] }
  0x3a   :  { %v66_v7 = vld [vmem:[#allocation2 + $0xd0] sm:$0xff]  ;;  %v69_v9 = vld [vmem:[#allocation2 + $0xe8] sm:$0xff]  ;;  %v52_v10 = vld [vmem:[#allocation2 + $0x60] sm:$0xff] }
  0x3b   :  { %382 = vmatpush3.bf16.msra.mxu0 %v381_v33  ;;  %407 = vmatpush3.bf16.msra.mxu1 %v381_v33  ;;  %v68_v11 = vld [vmem:[#allocation2 + $0xe0] sm:$0xff]  ;;  %v55_v12 = vld [vmem:[#allocation2 + $0x78] sm:$0xff]  ;;  %v54_v14 = vld [vmem:[#allocation2 + $0x70] sm:$0xff] }
  0x3c   :  { %384 = vmatprep.subr.bf16.mxu0 %v383_v34  ;;  %400 = vmatprep.subr.bf16.mxu1 %v383_v34  ;;  %v71_v13 = vld [vmem:[#allocation2 + $0xf8] sm:$0xff]  ;;  %v70_v15 = vld [vmem:[#allocation2 + $0xf0] sm:$0xff] }
  0x3f   :  { %386 = vmatpush3.bf16.msra.mxu0 %v385_v39  ;;  %408 = vmatpush3.bf16.msra.mxu1 %v385_v39 }
  0x40   :  { %388 = vmatprep.subr.bf16.mxu0 %v387_v40  ;;  %401 = vmatprep.subr.bf16.mxu1 %v387_v40 }
  0x43   :  { %390 = vmatpush3.bf16.msra.mxu0 %v389_v45  ;;  %409 = vmatpush3.bf16.msra.mxu1 %v389_v45 }
  0x44   :  { %392 = vmatprep.subr.bf16.mxu0 %v391_v46  ;;  %402 = vmatprep.subr.bf16.mxu1 %v391_v46 }
  0x47   :  { %394 = vmatpush3.bf16.msra.mxu0 %v393_v49  ;;  %410 = vmatpush3.bf16.msra.mxu1 %v393_v49 }
  0x4a   :  { %169 = vmatmul.mubr.f32.vlgmr.msra.gmra.mrb[0].mxu0 %v40_v50  ;;  %209 = vmatmul.mubr.f32.vlgmr.msra.gmra.mrb[0].mxu1 %v56_v51 }
  0x4b   :  { %173 = vmatprep.mubr.f32.mxu0 %v43_v52  ;;  %213 = vmatprep.mubr.f32.mxu1 %v59_v53 }
  0x4e   :  { %174 = vmatmul.mubr.f32.gmra.mrb[2].mxu0 %v42_v54  ;;  %214 = vmatmul.mubr.f32.gmra.mrb[2].mxu1 %v58_v55 }
  0x4f   :  { %178 = vmatprep.mubr.f32.mxu0 %v45_v56  ;;  %218 = vmatprep.mubr.f32.mxu1 %v61_v57 }
  0x52   :  { %179 = vmatmul.mubr.f32.gmra.mrb[4].mxu0 %v44_v58  ;;  %219 = vmatmul.mubr.f32.gmra.mrb[4].mxu1 %v60_v59 }
  0x53   :  { %183 = vmatprep.mubr.f32.mxu0 %v47_v60  ;;  %223 = vmatprep.mubr.f32.mxu1 %v63_v61 }
  0x56   :  { %184 = vmatmul.mubr.f32.gmra.mrb[6].mxu0 %v46_v62  ;;  %224 = vmatmul.mubr.f32.gmra.mrb[6].mxu1 %v62_v63 }
  0x57   :  { %188 = vmatprep.mubr.f32.mxu0 %v49_v0  ;;  %228 = vmatprep.mubr.f32.mxu1 %v65_v1 }
  0x5a   :  { %189 = vmatmul.mubr.f32.gmra.mrb[8].mxu0 %v48_v2  ;;  %229 = vmatmul.mubr.f32.gmra.mrb[8].mxu1 %v64_v3 }
  0x5b   :  { %193 = vmatprep.mubr.f32.mxu0 %v51_v4  ;;  %233 = vmatprep.mubr.f32.mxu1 %v67_v5 }
  0x5e   :  { %194 = vmatmul.mubr.f32.gmra.mrb[10].mxu0 %v50_v6  ;;  %234 = vmatmul.mubr.f32.gmra.mrb[10].mxu1 %v66_v7 }
  0x5f   :  { %198 = vmatprep.mubr.f32.mxu0 %v53_v8  ;;  %238 = vmatprep.mubr.f32.mxu1 %v69_v9 }
  0x62   :  { %199 = vmatmul.mubr.f32.gmra.mrb[12].mxu0 %v52_v10  ;;  %239 = vmatmul.mubr.f32.gmra.mrb[12].mxu1 %v68_v11 }
  0x63   :  { %203 = vmatprep.mubr.f32.mxu0 %v55_v12  ;;  %243 = vmatprep.mubr.f32.mxu1 %v71_v13 }
  0x66   :  { %204 = vmatmul.mubr.f32.gmra.mrb[14].mxu0 %v54_v14  ;;  %244 = vmatmul.mubr.f32.gmra.mrb[14].mxu1 %v70_v15 }
 0x11d   :  { %v315_v16 = vpop.f32.mrb[0].mxu0  ;;  %v339_v17 = vpop.f32.mrb[0].mxu1 }
 0x11e   :  { %v316_v18 = vpop.f32.mrb[1].mxu0  ;;  %v340_v19 = vpop.f32.mrb[1].mxu1 }
 0x11f   :  { %v317_v20 = vadd.f32 %v316_v18, %v315_v16  ;;  %v341_v21 = vadd.f32 %v340_v19, %v339_v17 }
 0x121   :  { %249 = vst [vmem:[#allocation7] sm:$0xff] %v317_v20  ;;  %257 = vst [vmem:[#allocation7 + $0x40] sm:$0xff] %v341_v21  ;;  %v318_v22 = vpop.f32.mrb[2].mxu0  ;;  %v342_v23 = vpop.f32.mrb[2].mxu1 }
 0x122   :  { %v319_v24 = vpop.f32.mrb[3].mxu0  ;;  %v343_v25 = vpop.f32.mrb[3].mxu1 }
 0x123   :  { %v320_v26 = vadd.f32 %v319_v24, %v318_v22  ;;  %v344_v27 = vadd.f32 %v343_v25, %v342_v23 }
 0x125   :  { %250 = vst [vmem:[#allocation7 + $0x8] sm:$0xff] %v320_v26  ;;  %258 = vst [vmem:[#allocation7 + $0x48] sm:$0xff] %v344_v27  ;;  %v321_v28 = vpop.f32.mrb[4].mxu0  ;;  %v345_v29 = vpop.f32.mrb[4].mxu1 }
 0x126   :  { %v322_v30 = vpop.f32.mrb[5].mxu0  ;;  %v346_v31 = vpop.f32.mrb[5].mxu1 }
 0x127   :  { %v323_v32 = vadd.f32 %v322_v30, %v321_v28  ;;  %v347_v33 = vadd.f32 %v346_v31, %v345_v29 }
 0x129   :  { %251 = vst [vmem:[#allocation7 + $0x10] sm:$0xff] %v323_v32  ;;  %259 = vst [vmem:[#allocation7 + $0x50] sm:$0xff] %v347_v33  ;;  %v324_v34 = vpop.f32.mrb[6].mxu0  ;;  %v348_v35 = vpop.f32.mrb[6].mxu1 }
 0x12a   :  { %v325_v36 = vpop.f32.mrb[7].mxu0  ;;  %v349_v37 = vpop.f32.mrb[7].mxu1 }
 0x12b   :  { %v326_v38 = vadd.f32 %v325_v36, %v324_v34  ;;  %v350_v39 = vadd.f32 %v349_v37, %v348_v35 }
 0x12d   :  { %252 = vst [vmem:[#allocation7 + $0x18] sm:$0xff] %v326_v38  ;;  %260 = vst [vmem:[#allocation7 + $0x58] sm:$0xff] %v350_v39  ;;  %v327_v40 = vpop.f32.mrb[8].mxu0  ;;  %v351_v41 = vpop.f32.mrb[8].mxu1 }
 0x12e   :  { %v328_v42 = vpop.f32.mrb[9].mxu0  ;;  %v352_v43 = vpop.f32.mrb[9].mxu1 }
 0x12f   :  { %v329_v44 = vadd.f32 %v328_v42, %v327_v40  ;;  %v353_v45 = vadd.f32 %v352_v43, %v351_v41 }
 0x131   :  { %253 = vst [vmem:[#allocation7 + $0x20] sm:$0xff] %v329_v44  ;;  %261 = vst [vmem:[#allocation7 + $0x60] sm:$0xff] %v353_v45  ;;  %v330_v46 = vpop.f32.mrb[10].mxu0  ;;  %v354_v47 = vpop.f32.mrb[10].mxu1 }
 0x132   :  { %v331_v48 = vpop.f32.mrb[11].mxu0  ;;  %v355_v49 = vpop.f32.mrb[11].mxu1 }
 0x133   :  { %v332_v50 = vadd.f32 %v331_v48, %v330_v46  ;;  %v356_v51 = vadd.f32 %v355_v49, %v354_v47 }
 0x135   :  { %254 = vst [vmem:[#allocation7 + $0x28] sm:$0xff] %v332_v50  ;;  %262 = vst [vmem:[#allocation7 + $0x68] sm:$0xff] %v356_v51  ;;  %v333_v52 = vpop.f32.mrb[12].mxu0  ;;  %v357_v53 = vpop.f32.mrb[12].mxu1 }
 0x136   :  { %v334_v54 = vpop.f32.mrb[13].mxu0  ;;  %v358_v55 = vpop.f32.mrb[13].mxu1 }
 0x137   :  { %v335_v56 = vadd.f32 %v334_v54, %v333_v52  ;;  %v359_v57 = vadd.f32 %v358_v55, %v357_v53 }
 0x139   :  { %255 = vst [vmem:[#allocation7 + $0x30] sm:$0xff] %v335_v56  ;;  %263 = vst [vmem:[#allocation7 + $0x70] sm:$0xff] %v359_v57  ;;  %v336_v58 = vpop.f32.mrb[14].mxu0  ;;  %v360_v59 = vpop.f32.mrb[14].mxu1 }
 0x13a   :  { %v337_v60 = vpop.f32.mrb[15].mxu0  ;;  %v361_v61 = vpop.f32.mrb[15].mxu1 }
 0x13b   :  { %v338_v62 = vadd.f32 %v337_v60, %v336_v58  ;;  %v362_v63 = vadd.f32 %v361_v61, %v360_v59 }
 0x13d   :  { %256 = vst [vmem:[#allocation7 + $0x38] sm:$0xff] %v338_v62  ;;  %264 = vst [vmem:[#allocation7 + $0x78] sm:$0xff] %v362_v63 }
 0x13e   :  { %473 = shalt.err (!%p470_p6)
}
 0x13f   :  { %s474_s12 = scalar_lea.hbm %s556_s2, 2048 }
 0x140   :  { %p475_p7 = scmp.ne.s32.totalorder %s556_s2, %s474_s12  ;;  %p478_p8 = scmp.lt.u32.totalorder %s474_s12, %s556_s2 }
 0x142   :  { %p480_p9 = pnand %p478_p8, %p475_p7 }
 0x144   :  { %483 = shalt.err (!%p480_p9)
}
 0x145   :  { %276 = dma.vmem_to_hbm [thread:$0]  %s271_s8, 2048, %s556_s2, [#allocation4], %s494_s0, %s494_s0, %s495_s5  }
 0x146   :  { %488 = dma.done.wait [#allocation4], 2048  }
 0x147   :  { %489 = vsyncadd [#allocation4], 4294965248 }
 0x148   :  { %280 = vsyncpa [#allocation3], 1 }
 0x149   :  { %281 = vsyncpa [#allocation6], 1 }
 0x14a   :  { %282 = vsyncpa [#allocation4], 1 }

</bundles_post_ra>
